<compile_context>
chip_gen: v7x
topology: tpu7x:2x2x1
jax: 0.10.0
libtpu: 0.0.40
codegen_flags: <defaults>
</compile_context>

<pallas_src>
import functools
import math

import jax
import jax.numpy as jnp
from jax.experimental import pallas as pl
from jax.experimental.pallas import tpu as pltpu


def _flash_attention_kernel(q_ref, k_ref, v_ref, o_ref,
                            q_sc, m_sc, l_sc, acc_sc, *,
                            scale, kv_len, qk_dtype, exp_dtype):
    # Blocks: q (1, Hp, Tq, D); k/v (1, Hp, Tk, D); out (1, 1, Tq, Hp*D).
    ki = pl.program_id(3)

    @pl.when(ki == 0)
    def _init():
        # Hoisted out of the kv loop: fold 1/sqrt(d) into q once per q-tile and
        # cast to the MXU compute dtype (bf16 for f32 inputs -> fast MXU path).
        q_sc[...] = (q_ref[0].astype(jnp.float32) * scale).astype(qk_dtype)
        m_sc[...] = jnp.full(m_sc.shape, -jnp.inf, dtype=m_sc.dtype)
        l_sc[...] = jnp.zeros(l_sc.shape, dtype=l_sc.dtype)
        acc_sc[...] = jnp.zeros(acc_sc.shape, dtype=acc_sc.dtype)

    k = k_ref[0].astype(qk_dtype)   # (Hp, Tk, D)
    v = v_ref[0]                    # (Hp, Tk, D), stays in the input dtype

    # scores = q @ k^T : contract the shared minor D axis (no k.T relayout),
    # f32 accumulation on the MXU.
    s = jnp.einsum("hqd,hkd->hqk", q_sc[...], k,
                   preferred_element_type=jnp.float32)        # (Hp, Tq, Tk) f32

    if kv_len is not None:
        # Tail-tile masking for a kv length that was padded up to a tile multiple.
        tk = k.shape[1]
        col = jax.lax.broadcasted_iota(jnp.int32, (1, 1, tk), 2) + ki * tk
        s = jnp.where(col < kv_len, s, -jnp.inf)

    # Online (flash) softmax update; running stats stay strictly f32.
    m_prev = m_sc[...]                                         # (Hp, Tq, 1)
    m_new = jnp.maximum(m_prev, jnp.max(s, axis=-1, keepdims=True))
    alpha = jnp.exp(m_prev - m_new)
    # exp in bf16 on chips with a bf16 EUP (v6e/v7x); f32 elsewhere.
    p = jnp.exp((s - m_new).astype(exp_dtype))                 # (Hp, Tq, Tk)

    l_sc[...] = alpha * l_sc[...] + jnp.sum(p, axis=-1, keepdims=True,
                                            dtype=jnp.float32)
    acc_sc[...] = alpha * acc_sc[...] + jnp.einsum(
        "hqk,hkd->hqd", p.astype(v.dtype), v,
        preferred_element_type=jnp.float32)                    # (Hp, Tq, D) f32
    m_sc[...] = m_new

    @pl.when(ki == pl.num_programs(3) - 1)
    def _finalize():
        hp = acc_sc.shape[0]
        d = acc_sc.shape[2]
        # Exact divide (runs once per q-tile on Hp*Tq*D values only).
        # Heads are packed along lanes so the HBM-bound output block is a
        # lane-dense (Tq, Hp*D) slab rather than a last-dim-D (< 128) tile.
        for h in range(hp):                                    # static, tiny
            o_ref[0, 0, :, h * d:(h + 1) * d] = (
                acc_sc[h] / l_sc[h]).astype(o_ref.dtype)


def _round_up(x, m):
    return ((x + m - 1) // m) * m


def _pad_and_tile(s, t_max):
    """Tile size (multiple of 8, capped at t_max) and padded sequence length."""
    if s <= t_max:
        t = _round_up(s, 8)
        return t, t
    return _round_up(s, t_max), t_max


def _pick_head_pack(h, d, tq, tk, score_budget, min_parallel, batch, n_q):
    """Largest divisor of H such that packed heads stay lane-friendly
    (Hp*D <= 128), the f32 score/prob temporaries fit the per-generation
    budget, and enough parallel grid steps remain for multi-TC chips (v7x)."""
    valid = [c for c in range(1, h + 1)
             if h % c == 0 and c * d <= 128
             and 4 * c * tq * tk * 4 <= score_budget]
    if not valid:
        valid = [1]
    hp = max(valid)
    while hp > 1 and batch * (h // hp) * n_q < min_parallel:
        smaller = [c for c in valid if c < hp]
        if not smaller:
            break
        hp = max(smaller)
    return hp


def _tpu_generation():
    try:
        kind = jax.devices()[0].device_kind.lower()
    except Exception:
        return 6
    if "v7" in kind or "7x" in kind:
        return 7
    if "v6" in kind:
        return 6
    if "v5" in kind or "v4" in kind:
        return 5
    return 6


def _generation_config(gen):
    if gen >= 7:
        # 64 MiB VMEM per TC, 2 TCs per chip.
        return dict(tq_max=256, tk_max=512,
                    vmem_cap=56 * 1024 * 1024,
                    score_budget=16 * 1024 * 1024,
                    bf16_exp=True, min_parallel=2)
    if gen == 6:
        # 128 MiB VMEM, bf16 EUP/VPU.
        return dict(tq_max=512, tk_max=1024,
                    vmem_cap=100 * 1024 * 1024,
                    score_budget=32 * 1024 * 1024,
                    bf16_exp=True, min_parallel=1)
    # v5e (and older): 128 MiB VMEM, no bf16 EUP/VPU.
    return dict(tq_max=512, tk_max=1024,
                vmem_cap=100 * 1024 * 1024,
                score_budget=32 * 1024 * 1024,
                bf16_exp=False, min_parallel=1)


def standard_attention(query, key, value, head_dim=None, fast_math=True):
    """Pallas implementation of StandardAttention.forward.

    query/key/value: [B, H, S, D]; head_dim defaults to D (= embed_dim // n_heads).
    fast_math=True uses bf16 QK^T (and bf16 exp on v6e/v7x) with f32 accumulation.
    """
    B, H, S, D = query.shape
    if head_dim is None:
        head_dim = D
    scale = 1.0 / math.sqrt(float(head_dim))

    gen = _tpu_generation()
    cfg = _generation_config(gen)

    # Tile sizes + padded lengths (q and kv padded independently).
    sq_pad, tq = _pad_and_tile(S, cfg["tq_max"])
    skv_pad, tk = _pad_and_tile(S, cfg["tk_max"])
    n_q = sq_pad // tq
    n_k = skv_pad // tk

    hp = _pick_head_pack(H, D, tq, tk, cfg["score_budget"],
                         cfg["min_parallel"], B, n_q)
    n_hg = H // hp
    out_last = hp * D

    in_dtype = query.dtype
    if fast_math and in_dtype == jnp.float32:
        qk_dtype = jnp.bfloat16          # fast MXU path, f32 accumulation
    else:
        qk_dtype = in_dtype
    exp_dtype = jnp.bfloat16 if (fast_math and cfg["bf16_exp"]) else jnp.float32

    # Pad sequence dims to tile multiples; padded key columns are masked in the
    # kernel and padded query rows are sliced off below.  This replaces the old
    # full-extent S x S fallback for non-tile-divisible S.
    q_in, k_in, v_in = query, key, value
    if sq_pad != S:
        q_in = jnp.pad(query, ((0, 0), (0, 0), (0, sq_pad - S), (0, 0)))
    if skv_pad != S:
        k_in = jnp.pad(key, ((0, 0), (0, 0), (0, skv_pad - S), (0, 0)))
        v_in = jnp.pad(value, ((0, 0), (0, 0), (0, skv_pad - S), (0, 0)))
    kv_len = S if skv_pad != S else None

    kernel = functools.partial(_flash_attention_kernel, scale=scale,
                               kv_len=kv_len, qk_dtype=qk_dtype,
                               exp_dtype=exp_dtype)

    q_spec = pl.BlockSpec((1, hp, tq, D), lambda b, hg, qi, ki: (b, hg, qi, 0))
    kv_block = (1, hp, tk, D)
    kv_map = lambda b, hg, qi, ki: (b, hg, ki, 0)
    kv_spec = pl.BlockSpec(kv_block, kv_map)
    if n_k >= 3:
        # Deeper buffering on the streamed K/V tiles hides per-step DMA issue
        # latency when D is small; q/out keep the default (resident across ki).
        try:
            kv_spec = pl.BlockSpec(kv_block, kv_map,
                                   pipeline_mode=pl.Buffered(3))
        except Exception:
            kv_spec = pl.BlockSpec(kv_block, kv_map)
    out_spec = pl.BlockSpec((1, 1, tq, out_last),
                            lambda b, hg, qi, ki: (b, hg, qi, 0))

    # Scoped-VMEM budget with headroom, clamped per generation (and to the
    # physical VMEM when the runtime reports it).
    itemsize = jnp.dtype(in_dtype).itemsize
    kv_bufs = 3 if n_k >= 3 else 2
    est = 2 * hp * tq * D * itemsize                       # q, double-buffered
    est += 2 * tq * out_last * itemsize                    # out, double-buffered
    est += 2 * kv_bufs * hp * tk * D * itemsize            # k + v streams
    est += hp * tq * D * jnp.dtype(qk_dtype).itemsize      # scaled-q scratch
    est += hp * tq * (D + 2) * 4                           # m, l, acc scratch
    est += 4 * hp * tq * tk * 4                            # score/prob temporaries
    vmem_cap = cfg["vmem_cap"]
    try:
        vmem_cap = min(vmem_cap,
                       int(pltpu.get_tpu_info().vmem_capacity_bytes * 0.875))
    except Exception:
        pass
    vmem_limit = int(min(max(2 * est, 32 * 1024 * 1024), vmem_cap))

    out = pl.pallas_call(
        kernel,
        out_shape=jax.ShapeDtypeStruct((B, n_hg, sq_pad, out_last), in_dtype),
        grid_spec=pltpu.PrefetchScalarGridSpec(
            num_scalar_prefetch=0,
            grid=(B, n_hg, n_q, n_k),
            in_specs=[q_spec, kv_spec, kv_spec],
            out_specs=out_spec,
            scratch_shapes=[
                pltpu.VMEM((hp, tq, D), qk_dtype),     # scaled q (per q-tile)
                pltpu.VMEM((hp, tq, 1), jnp.float32),  # running max m
                pltpu.VMEM((hp, tq, 1), jnp.float32),  # running sum l
                pltpu.VMEM((hp, tq, D), jnp.float32),  # f32 output accumulator
            ],
        ),
        compiler_params=pltpu.CompilerParams(
            dimension_semantics=("parallel", "parallel", "parallel", "arbitrary"),
            vmem_limit_bytes=vmem_limit,
        ),
    )(q_in, k_in, v_in)

    # Lane-dense slab [B, n_hg, Sq_pad, Hp*D] -> [B, H, S, D].
    out = out.reshape(B, n_hg, sq_pad, hp, D)
    out = jnp.transpose(out, (0, 1, 3, 2, 4)).reshape(B, H, sq_pad, D)
    if sq_pad != S:
        out = out[:, :, :S, :]
    return out


def _reference_attention(q, k, v, head_dim):
    scale = 1.0 / jnp.sqrt(jnp.asarray(head_dim, jnp.float32))
    scores = jnp.einsum("bhqd,bhkd->bhqk", q.astype(jnp.float32),
                        k.astype(jnp.float32)) * scale
    attn = jax.nn.softmax(scores, axis=-1)
    return jnp.einsum("bhqk,bhkd->bhqd", attn, v.astype(jnp.float32))


if __name__ == "__main__":
    # StandardAttention(embed_dim=32, n_heads=2) -> head_dim = 16.
    embed_dim, n_heads = 32, 2
    head_dim = embed_dim // n_heads
    B, S = 2, 8

    rng = jax.random.PRNGKey(0)
    kq, kk, kv = jax.random.split(rng, 3)
    q = jax.random.normal(kq, (B, n_heads, S, head_dim), dtype=jnp.float32)
    k = jax.random.normal(kk, (B, n_heads, S, head_dim), dtype=jnp.float32)
    v = jax.random.normal(kv, (B, n_heads, S, head_dim), dtype=jnp.float32)

    ref = _reference_attention(q, k, v, head_dim)

    # 1) Exact-math path (f32 matmul / f32 exp): tight check of the flash recurrence.
    out_exact = jax.block_until_ready(
        standard_attention(q, k, v, head_dim=head_dim, fast_math=False))
    assert out_exact.shape == (B, n_heads, S, head_dim)
    assert jnp.allclose(out_exact, ref, atol=1e-5, rtol=1e-5), \
        "exact-path mismatch vs reference"

    # 2) Fast-math path (default): bf16 QK^T (+ bf16 exp on v6e/v7x) with f32
    #    accumulation; tolerance reflects bf16 compute precision.
    out_fast = jax.block_until_ready(
        standard_attention(q, k, v, head_dim=head_dim))
    assert jnp.allclose(out_fast, ref, atol=5e-2, rtol=5e-2), \
        "fast-path mismatch vs reference"

    # 3) Non-tile-divisible sequence length exercises the padded / masked-kv path.
    S2 = 12
    kq2, kk2, kv2 = jax.random.split(jax.random.PRNGKey(1), 3)
    q2 = jax.random.normal(kq2, (B, n_heads, S2, head_dim), dtype=jnp.float32)
    k2 = jax.random.normal(kk2, (B, n_heads, S2, head_dim), dtype=jnp.float32)
    v2 = jax.random.normal(kv2, (B, n_heads, S2, head_dim), dtype=jnp.float32)
    out_pad = jax.block_until_ready(
        standard_attention(q2, k2, v2, head_dim=head_dim, fast_math=False))
    assert jnp.allclose(out_pad, _reference_attention(q2, k2, v2, head_dim),
                        atol=1e-5, rtol=1e-5), "padded-path mismatch vs reference"

    print("KERNEL_OK")
</pallas_src>

<mosaic_0001>
module attributes {stable_mosaic.version = 11 : i64} {
  func.func @_flash_attention_kernel(%arg0: i32, %arg1: i32, %arg2: i32, %arg3: i32, %arg4: memref<1x2x8x16xf32, #tpu.memory_space<vmem>>, %arg5: memref<1x2x8x16xf32, #tpu.memory_space<vmem>>, %arg6: memref<1x2x8x16xf32, #tpu.memory_space<vmem>>, %arg7: memref<1x1x8x32xf32, #tpu.memory_space<vmem>>, %arg8: memref<2x8x16xf32, #tpu.memory_space<vmem>>, %arg9: memref<2x8x1xf32, #tpu.memory_space<vmem>>, %arg10: memref<2x8x1xf32, #tpu.memory_space<vmem>>, %arg11: memref<2x8x16xf32, #tpu.memory_space<vmem>>) attributes {dimension_semantics = [#tpu.dimension_semantics<parallel>, #tpu.dimension_semantics<parallel>, #tpu.dimension_semantics<parallel>, #tpu.dimension_semantics<arbitrary>], iteration_bounds = array<i64: 2, 1, 1, 1>, scalar_prefetch = 0 : i64, scratch_operands = 4 : i64, tpu.core_type = #tpu.core_type<tc>, window_params = [{transform_indices = @transform_0, window_bounds = array<i64: 1, 2, 8, 16>}, {transform_indices = @transform_1, window_bounds = array<i64: 1, 2, 8, 16>}, {transform_indices = @transform_2, window_bounds = array<i64: 1, 2, 8, 16>}, {transform_indices = @transform_3, window_bounds = array<i64: 1, 1, 8, 32>}]} {
    %c0_i32 = arith.constant 0 : i32
    %0 = arith.cmpi eq, %arg3, %c0_i32 : i32
    %1 = arith.extui %0 : i1 to i32
    %c0_i32_0 = arith.constant 0 : i32
    %2 = arith.cmpi ne, %1, %c0_i32_0 : i32
    scf.if %2 {
      %c0_34 = arith.constant 0 : index
      %c0_35 = arith.constant 0 : index
      %c0_36 = arith.constant 0 : index
      %c0_37 = arith.constant 0 : index
      %34 = vector.load %arg4[%c0_34, %c0_35, %c0_36, %c0_37] : memref<1x2x8x16xf32, #tpu.memory_space<vmem>>, vector<1x2x8x16xf32>
      %35 = vector.shape_cast %34 : vector<1x2x8x16xf32> to vector<2x8x16xf32>
      %cst_38 = arith.constant 2.500000e-01 : f32
      %36 = vector.broadcast %cst_38 : f32 to vector<2x8x16xf32>
      %37 = arith.mulf %35, %36 : vector<2x8x16xf32>
      %c0_39 = arith.constant 0 : index
      %c0_40 = arith.constant 0 : index
      %c0_41 = arith.constant 0 : index
      %38 = vector.load %arg8[%c0_39, %c0_40, %c0_41] : memref<2x8x16xf32, #tpu.memory_space<vmem>>, vector<2x8x16xf32>
      tpu.vector_store %arg8[%c0_39, %c0_40, %c0_41], %37 {strides = array<i32>} : memref<2x8x16xf32, #tpu.memory_space<vmem>>, vector<2x8x16xf32>,
      %cst_42 = arith.constant 0xFF800000 : f32
      %39 = vector.broadcast %cst_42 : f32 to vector<2x8x1xf32>
      %c0_43 = arith.constant 0 : index
      %c0_44 = arith.constant 0 : index
      %c0_45 = arith.constant 0 : index
      %40 = vector.load %arg9[%c0_43, %c0_44, %c0_45] : memref<2x8x1xf32, #tpu.memory_space<vmem>>, vector<2x8x1xf32>
      tpu.vector_store %arg9[%c0_43, %c0_44, %c0_45], %39 {strides = array<i32>} : memref<2x8x1xf32, #tpu.memory_space<vmem>>, vector<2x8x1xf32>,
      %cst_46 = arith.constant 0.000000e+00 : f32
      %41 = vector.broadcast %cst_46 : f32 to vector<2x8x1xf32>
      %c0_47 = arith.constant 0 : index
      %c0_48 = arith.constant 0 : index
      %c0_49 = arith.constant 0 : index
      %42 = vector.load %arg10[%c0_47, %c0_48, %c0_49] : memref<2x8x1xf32, #tpu.memory_space<vmem>>, vector<2x8x1xf32>
      tpu.vector_store %arg10[%c0_47, %c0_48, %c0_49], %41 {strides = array<i32>} : memref<2x8x1xf32, #tpu.memory_space<vmem>>, vector<2x8x1xf32>,
      %cst_50 = arith.constant 0.000000e+00 : f32
      %43 = vector.broadcast %cst_50 : f32 to vector<2x8x16xf32>
      %c0_51 = arith.constant 0 : index
      %c0_52 = arith.constant 0 : index
      %c0_53 = arith.constant 0 : index
      %44 = vector.load %arg11[%c0_51, %c0_52, %c0_53] : memref<2x8x16xf32, #tpu.memory_space<vmem>>, vector<2x8x16xf32>
      tpu.vector_store %arg11[%c0_51, %c0_52, %c0_53], %43 {strides = array<i32>} : memref<2x8x16xf32, #tpu.memory_space<vmem>>, vector<2x8x16xf32>,
    } else {
    }
    %c0 = arith.constant 0 : index
    %c0_1 = arith.constant 0 : index
    %c0_2 = arith.constant 0 : index
    %c0_3 = arith.constant 0 : index
    %3 = vector.load %arg5[%c0, %c0_1, %c0_2, %c0_3] : memref<1x2x8x16xf32, #tpu.memory_space<vmem>>, vector<1x2x8x16xf32>
    %4 = vector.shape_cast %3 : vector<1x2x8x16xf32> to vector<2x8x16xf32>
    %c0_4 = arith.constant 0 : index
    %c0_5 = arith.constant 0 : index
    %c0_6 = arith.constant 0 : index
    %c0_7 = arith.constant 0 : index
    %5 = vector.load %arg6[%c0_4, %c0_5, %c0_6, %c0_7] : memref<1x2x8x16xf32, #tpu.memory_space<vmem>>, vector<1x2x8x16xf32>
    %6 = vector.shape_cast %5 : vector<1x2x8x16xf32> to vector<2x8x16xf32>
    %c0_8 = arith.constant 0 : index
    %c0_9 = arith.constant 0 : index
    %c0_10 = arith.constant 0 : index
    %7 = vector.load %arg8[%c0_8, %c0_9, %c0_10] : memref<2x8x16xf32, #tpu.memory_space<vmem>>, vector<2x8x16xf32>
    "tpu.trace_start"() <{level = 10 : i32, message = "hqd,hkd->hqk"}> : () -> ()
    %cst = arith.constant dense<0.000000e+00> : vector<2x8x8xf32>
    %8 = tpu.matmul %7, %4, %cst {dimension_numbers = #tpu.dot_dimension_numbers<[2], [2], [1], [1], [0, 0, 0, 1, 1, 1], [0], [0]>} : vector<2x8x16xf32>, vector<2x8x16xf32>, vector<2x8x8xf32> -> vector<2x8x8xf32>
    "tpu.trace_stop"() : () -> ()
    %c0_11 = arith.constant 0 : index
    %c0_12 = arith.constant 0 : index
    %c0_13 = arith.constant 0 : index
    %9 = vector.load %arg9[%c0_11, %c0_12, %c0_13] : memref<2x8x1xf32, #tpu.memory_space<vmem>>, vector<2x8x1xf32>
    %cst_14 = arith.constant dense<0xFF800000> : vector<2x8xf32>
    %10 = vector.multi_reduction <maximumf>, %8, %cst_14 [2] : vector<2x8x8xf32> to vector<2x8xf32>
    %11 = vector.shape_cast %10 : vector<2x8xf32> to vector<2x8x1xf32>
    %12 = arith.maximumf %9, %11 : vector<2x8x1xf32>
    %13 = arith.subf %9, %12 : vector<2x8x1xf32>
    %14 = math.exp %13 : vector<2x8x1xf32>
    %15 = vector.broadcast %12 : vector<2x8x1xf32> to vector<2x8x8xf32>
    %16 = arith.subf %8, %15 : vector<2x8x8xf32>
    %17 = math.exp %16 : vector<2x8x8xf32>
    %c0_15 = arith.constant 0 : index
    %c0_16 = arith.constant 0 : index
    %c0_17 = arith.constant 0 : index
    %18 = vector.load %arg10[%c0_15, %c0_16, %c0_17] : memref<2x8x1xf32, #tpu.memory_space<vmem>>, vector<2x8x1xf32>
    %19 = arith.mulf %14, %18 : vector<2x8x1xf32>
    %cst_18 = arith.constant dense<0.000000e+00> : vector<2x8xf32>
    %20 = vector.multi_reduction <add>, %17, %cst_18 [2] : vector<2x8x8xf32> to vector<2x8xf32>
    %21 = vector.shape_cast %20 : vector<2x8xf32> to vector<2x8x1xf32>
    %22 = arith.addf %19, %21 : vector<2x8x1xf32>
    %c0_19 = arith.constant 0 : index
    %c0_20 = arith.constant 0 : index
    %c0_21 = arith.constant 0 : index
    %23 = vector.load %arg10[%c0_19, %c0_20, %c0_21] : memref<2x8x1xf32, #tpu.memory_space<vmem>>, vector<2x8x1xf32>
    tpu.vector_store %arg10[%c0_19, %c0_20, %c0_21], %22 {strides = array<i32>} : memref<2x8x1xf32, #tpu.memory_space<vmem>>, vector<2x8x1xf32>,
    %c0_22 = arith.constant 0 : index
    %c0_23 = arith.constant 0 : index
    %c0_24 = arith.constant 0 : index
    %24 = vector.load %arg11[%c0_22, %c0_23, %c0_24] : memref<2x8x16xf32, #tpu.memory_space<vmem>>, vector<2x8x16xf32>
    %25 = vector.broadcast %14 : vector<2x8x1xf32> to vector<2x8x16xf32>
    %26 = arith.mulf %25, %24 : vector<2x8x16xf32>
    "tpu.trace_start"() <{level = 10 : i32, message = "hqk,hkd->hqd"}> : () -> ()
    %cst_25 = arith.constant dense<0.000000e+00> : vector<2x8x16xf32>
    %27 = tpu.matmul %17, %6, %cst_25 {dimension_numbers = #tpu.dot_dimension_numbers<[2], [1], [1], [2], [0, 0, 0, 1, 1, 2], [0], [0]>} : vector<2x8x8xf32>, vector<2x8x16xf32>, vector<2x8x16xf32> -> vector<2x8x16xf32>
    "tpu.trace_stop"() : () -> ()
    %28 = arith.addf %26, %27 : vector<2x8x16xf32>
    %c0_26 = arith.constant 0 : index
    %c0_27 = arith.constant 0 : index
    %c0_28 = arith.constant 0 : index
    %29 = vector.load %arg11[%c0_26, %c0_27, %c0_28] : memref<2x8x16xf32, #tpu.memory_space<vmem>>, vector<2x8x16xf32>
    tpu.vector_store %arg11[%c0_26, %c0_27, %c0_28], %28 {strides = array<i32>} : memref<2x8x16xf32, #tpu.memory_space<vmem>>, vector<2x8x16xf32>,
    %c0_29 = arith.constant 0 : index
    %c0_30 = arith.constant 0 : index
    %c0_31 = arith.constant 0 : index
    %30 = vector.load %arg9[%c0_29, %c0_30, %c0_31] : memref<2x8x1xf32, #tpu.memory_space<vmem>>, vector<2x8x1xf32>
    tpu.vector_store %arg9[%c0_29, %c0_30, %c0_31], %12 {strides = array<i32>} : memref<2x8x1xf32, #tpu.memory_space<vmem>>, vector<2x8x1xf32>,
    %c0_i32_32 = arith.constant 0 : i32
    %31 = arith.cmpi eq, %arg3, %c0_i32_32 : i32
    %32 = arith.extui %31 : i1 to i32
    %c0_i32_33 = arith.constant 0 : i32
    %33 = arith.cmpi ne, %32, %c0_i32_33 : i32
    scf.if %33 {
      %c0_34 = arith.constant 0 : index
      %c0_35 = arith.constant 0 : index
      %c0_36 = arith.constant 0 : index
      %34 = vector.load %arg11[%c0_34, %c0_35, %c0_36] : memref<2x8x16xf32, #tpu.memory_space<vmem>>, vector<1x8x16xf32>
      %35 = vector.shape_cast %34 : vector<1x8x16xf32> to vector<8x16xf32>
      %c0_37 = arith.constant 0 : index
      %c0_38 = arith.constant 0 : index
      %c0_39 = arith.constant 0 : index
      %36 = vector.load %arg10[%c0_37, %c0_38, %c0_39] : memref<2x8x1xf32, #tpu.memory_space<vmem>>, vector<1x8x1xf32>
      %37 = vector.shape_cast %36 : vector<1x8x1xf32> to vector<8x1xf32>
      %38 = vector.broadcast %37 : vector<8x1xf32> to vector<8x16xf32>
      %39 = arith.divf %35, %38 : vector<8x16xf32>
      %c0_40 = arith.constant 0 : index
      %c0_41 = arith.constant 0 : index
      %c0_42 = arith.constant 0 : index
      %c0_43 = arith.constant 0 : index
      %40 = vector.load %arg7[%c0_40, %c0_41, %c0_42, %c0_43] : memref<1x1x8x32xf32, #tpu.memory_space<vmem>>, vector<1x1x8x16xf32>
      %41 = vector.shape_cast %40 : vector<1x1x8x16xf32> to vector<8x16xf32>
      %42 = vector.shape_cast %39 : vector<8x16xf32> to vector<1x1x8x16xf32>
      tpu.vector_store %arg7[%c0_40, %c0_41, %c0_42, %c0_43], %42 {strides = array<i32>} : memref<1x1x8x32xf32, #tpu.memory_space<vmem>>, vector<1x1x8x16xf32>,
      %c1 = arith.constant 1 : index
      %c0_44 = arith.constant 0 : index
      %c0_45 = arith.constant 0 : index
      %43 = vector.load %arg11[%c1, %c0_44, %c0_45] : memref<2x8x16xf32, #tpu.memory_space<vmem>>, vector<1x8x16xf32>
      %44 = vector.shape_cast %43 : vector<1x8x16xf32> to vector<8x16xf32>
      %c1_46 = arith.constant 1 : index
      %c0_47 = arith.constant 0 : index
      %c0_48 = arith.constant 0 : index
      %45 = vector.load %arg10[%c1_46, %c0_47, %c0_48] : memref<2x8x1xf32, #tpu.memory_space<vmem>>, vector<1x8x1xf32>
      %46 = vector.shape_cast %45 : vector<1x8x1xf32> to vector<8x1xf32>
      %47 = vector.broadcast %46 : vector<8x1xf32> to vector<8x16xf32>
      %48 = arith.divf %44, %47 : vector<8x16xf32>
      %c0_49 = arith.constant 0 : index
      %c0_50 = arith.constant 0 : index
      %c0_51 = arith.constant 0 : index
      %c16 = arith.constant 16 : index
      %49 = vector.load %arg7[%c0_49, %c0_50, %c0_51, %c16] : memref<1x1x8x32xf32, #tpu.memory_space<vmem>>, vector<1x1x8x16xf32>
      %50 = vector.shape_cast %49 : vector<1x1x8x16xf32> to vector<8x16xf32>
      %51 = vector.shape_cast %48 : vector<8x16xf32> to vector<1x1x8x16xf32>
      tpu.vector_store %arg7[%c0_49, %c0_50, %c0_51, %c16], %51 {strides = array<i32>} : memref<1x1x8x32xf32, #tpu.memory_space<vmem>>, vector<1x1x8x16xf32>,
    } else {
    }
    return
  }
  func.func @transform_0(%arg0: i32, %arg1: i32, %arg2: i32, %arg3: i32) -> (i32, i32, i32, i32) {
    %c0_i32 = arith.constant 0 : i32
    %c0_i32_0 = arith.constant 0 : i32
    return %arg0, %arg1, %arg2, %c0_i32 : i32, i32, i32, i32
  }
  func.func @transform_1(%arg0: i32, %arg1: i32, %arg2: i32, %arg3: i32) -> (i32, i32, i32, i32) {
    %c0_i32 = arith.constant 0 : i32
    %c0_i32_0 = arith.constant 0 : i32
    return %arg0, %arg1, %arg3, %c0_i32 : i32, i32, i32, i32
  }
  func.func @transform_2(%arg0: i32, %arg1: i32, %arg2: i32, %arg3: i32) -> (i32, i32, i32, i32) {
    %c0_i32 = arith.constant 0 : i32
    %c0_i32_0 = arith.constant 0 : i32
    return %arg0, %arg1, %arg3, %c0_i32 : i32, i32, i32, i32
  }
  func.func @transform_3(%arg0: i32, %arg1: i32, %arg2: i32, %arg3: i32) -> (i32, i32, i32, i32) {
    %c0_i32 = arith.constant 0 : i32
    %c0_i32_0 = arith.constant 0 : i32
    return %arg0, %arg1, %arg2, %c0_i32 : i32, i32, i32, i32
  }
}

</mosaic_0001>

<bundles_post_ra>
// kernel: tpu_custom_call.1
= control target key start
LH: loop header
LB: loop body
LE: loop exit
PB: predicated region body
PF: predicated region fallthrough
CT: control target
= control target key end

     0   :  { %s1570_s0 = inlined_call_operand.hbm [shape: f32[2,2,8,16], index: 0, kind: input, shape index: {}]   ;;  %s1571_s1 = inlined_call_operand.hbm [shape: f32[2,2,8,16], index: 1, kind: input, shape index: {}]   ;;  %s1572_s2 = inlined_call_operand.hbm [shape: f32[2,2,8,16], index: 2, kind: input, shape index: {}]   ;;  %s1573_s3 = inlined_call_operand.hbm [shape: f32[2,1,8,32], index: 3, kind: output, shape index: {}]  }
   0x1   :  { %1583 = sst [smem:[#allocation19_spill]] %s1571_s1 }
   0x2   :  { %8 = vsyncpa [#allocation7], 0 }
   0x3   :  { %10 = vsyncpa [#allocation7 + $0x1], 0 }
   0x4   :  { %11 = vsyncpa [#allocation10], 0 }
   0x5   :  { %13 = vsyncpa [#allocation10 + $0x1], 0 }
   0x6   :  { %14 = vsyncpa [#allocation8], 0 }
   0x7   :  { %16 = vsyncpa [#allocation8 + $0x1], 0  ;;  %s1259_s12 = smov 0   ;;  %s1261_s13 = smov 0  }
   0x8   :  { %s1263_s14 = smov 0   ;;  %s1265_s15 = smov 0  }
   0x9   :  { %s1267_s16 = smov 0   ;;  %s1269_s17 = smov 0  }
   0xa LB: > { %1584 = sst [smem:[#allocation16_spill]] %s1222_s16  ;;  %s1290_s18 = sadd.s32 4294967295, %s1226_s17   ;;  %s1226_s17 = sphi %s1269_s17, %s22_s17   ;;  %s1222_s16 = sphi %s1267_s16, %s1607_s16   ;;  %s1218_s15 = sphi %s1265_s15, %s1606_s15   ;;  %s1214_s14 = sphi %s1263_s14, %s1610_s14   ;;  %s1210_s13 = sphi %s1261_s13, %s1609_s13   ;;  %s1206_s12 = sphi %s1259_s12, %s1608_s12  }
   0xb   : > { %s899_s19 = sadd.s32 4294967294, %s1226_s17   ;;  %s48_s20 = sadd.s32 1, %s1222_s16 }
   0xc   : > { %s59_s21 = sadd.s32 1, %s1214_s14  ;;  %p50_p0 = scmp.ge.s32.totalorder %s48_s20, 2 }
   0xd   : > { %p66_p1 = scmp.ne.s32.totalorder %s1214_s14, %s1210_s13  ;;  %p67_p2 = scmp.eq.s32.totalorder %s1226_s17, 0 }
   0xe   : > { %p72_p3 = scmp.ne.s32.totalorder %s1210_s13, %s1206_s12  ;;  %s1612_s20 = smov (%p50_p0, %s48_s20), 0 }
   0xf   : > { %1585 = sst [smem:[#allocation17_spill]] %s1612_s20  ;;  %p1302_p4 = por %p67_p2, %p66_p1 }
  0x10   : > { %p73_p5 = scmp.eq.s32.totalorder %s1290_s18, 0  ;;  %s52_s23 = ssub.s32 %s1222_s16, %s1612_s20 }
  0x11   : > { %p160_p6 = scmp.eq.s32.totalorder %s1290_s18, 1  ;;  %p57_p7 = scmp.eq.s32.totalorder %s52_s23, 0 }
  0x12   : > { %p1310_p8 = por %p73_p5, %p72_p3  ;;  %p166_p10 = scmp.eq.s32.totalorder %s899_s19, 1 }
  0x13   : > { %p1314_p9 = por %p160_p6, %p66_p1  ;;  %p979_p13 = scmp.lt.s32.totalorder %s1226_s17, 2 }
  0x14   : > { %s1587_s24 = scalar_select %p1310_p8, 1, 0 }
  0x15   : > { %s1588_s25 = scalar_select %p1314_p9, 1, 0 }
  0x16   : > { %s1319_s26 = scalar_select %p57_p7, %s1214_s14, %s59_s21  }
  0x17   : > { %p1321_p11 = por %p166_p10, %p72_p3  ;;  %s1576_s28 = sand.u32 1, %s1214_s14  }
  0x18   : > { %1589 = sst [smem:[#allocation18_spill]] %s1319_s26  ;;  %s1330_s29 = sshll.u32 %s1576_s28, 4 }
  0x19   : > { %s1590_s27 = scalar_select %p1321_p11, 1, 0 }
  0x1a   : > { %s1333_s30 = sshll.u32 %s1222_s16, 8  ;;  %p1337_p0 = pnand %p979_p13, %p1302_p4 }
  0x1b   : > { %s210_s5 = sand.u32 1, %s1226_s17   ;;  %s1592_s1 = sld [smem:[#allocation19_spill]] }
  0x1c   : > { %s214_s9 = scalar_lea.vmem [#allocation9], %s1330_s29  ;;  %s1353_s11 = scalar_lea.sflag [#allocation10], %s210_s5 }
  0x1d   : > { %s224_s10 = sshll.u32 %s214_s9, 4  ;;  %p1359_p4 = pneg %p1337_p0  ;;  %s1350_s10 = int_to_ptr.vmem [resolvable:$true] %s224_s10 }
  0x21   : > { %s1346_s8 = scalar_lea.hbm %s1592_s1, %s1333_s30  ;;  %s1055_s6 = scalar_lea.hbm %s1592_s1, 512 }
  0x22   : > { %s1050_s19 = scalar_lea.hbm %s1346_s8, 256  ;;  %p1056_p7 = scmp.lt.u32.totalorder %s1346_s8, %s1592_s1 }
  0x23   : > { %p1051_p3 = scmp.ne.s32.totalorder %s1346_s8, %s1050_s19  ;;  %p1057_p10 = scmp.lt.u32.totalorder %s1055_s6, %s1050_s19 }
  0x24   : > { %p1059_p12 = scmp.lt.u32.totalorder %s1050_s19, %s1346_s8 }
  0x25   : > { %p1053_p5 = pnand %p1359_p4, %p1051_p3  ;;  %p1058_p13 = por %p1057_p10, %p1056_p7 }
  0x27   : > { %p1054_p6 = pneg %p1053_p5  ;;  %p1060_p1 = por %p1059_p12, %p1058_p13 }
  0x29   : > { %p1061_p2 = pnand %p1060_p1, %p1054_p6 }
  0x2b   : > { %1064 = shalt.err (!%p1061_p2)
}
  0x2c   : > { %s1065_s5 = scalar_lea.vmem %s1350_s10, 256  ;;  %s1228_s22 = smov [#allocation9]  }
  0x2d   : > { %p1066_p3 = scmp.ne.s32.totalorder %s1350_s10, %s1065_s5  ;;  %s1070_s23 = sshll.u32 %s1228_s22, 4  ;;  %s1071_s23 = int_to_ptr.vmem [resolvable:$false] %s1070_s23 }
  0x2e   : > { %s1072_s7 = scalar_lea.vmem %s1071_s23, 512  ;;  %p1073_p9 = scmp.lt.s32.totalorder %s1350_s10, %s1071_s23 }
  0x2f   : > { %p1068_p5 = pnand %p1066_p3, %p1359_p4  ;;  %p1074_p8 = scmp.lt.s32.totalorder %s1072_s7, %s1065_s5 }
  0x31   : > { %p1069_p11 = pneg %p1068_p5  ;;  %p1075_p7 = por %p1074_p8, %p1073_p9 }
  0x33   : > { %p1076_p10 = pnand %p1075_p7, %p1069_p11 }
  0x35   : > { %1079 = shalt.err (!%p1076_p10)
}
  0x36   : > { %s1577_s19 = smov 128   ;;  %s1579_s6 = smov 8  }
  0x37   : > { %971 = dma.hbm_to_vmem [thread:$0]  (!%p1337_p0), %s1346_s8, 256, %s1350_s10, %s1353_s11, %s1577_s19, %s1577_s19, %s1579_s6  }
  0x38   : > { %p1594_p8 = scmp.lt.s32.totalorder %s1226_s17, 3  ;;  %p1595_p9 = scmp.ge.s32.totalorder %s1226_s17, 1 }
  0x39   : > { %s1398_s23 = scalar_lea.hbm %s1570_s0, %s1333_s30  ;;  %s190_s7 = scalar_lea.vmem [#allocation6], %s1330_s29 }
  0x3a   : > { %p1390_p11 = pnand %p1595_p9, %p1594_p8  ;;  %s200_s28 = sshll.u32 %s190_s7, 4  ;;  %s1401_s28 = int_to_ptr.vmem [resolvable:$true] %s200_s28 }
  0x3b   : > { %s1407_s19 = scalar_lea.hbm %s1572_s2, %s1333_s30  ;;  %s1597_s6 = sand.u32 1, %s1214_s14  }
  0x3c   : > { %s1596_s9 = scalar_select %p1390_p11, 1, 0 }
  0x3d   : > { %s1411_s1 = scalar_lea.sflag [#allocation7], %s1597_s6  ;;  %s1080_s20 = scalar_lea.hbm %s1398_s23, 256 }
  0x3e   : > { %p1081_p12 = scmp.ne.s32.totalorder %s1398_s23, %s1080_s20  ;;  %s1085_s16 = scalar_lea.hbm %s1570_s0, 512 }
  0x3f   : > { %p1086_p6 = scmp.lt.u32.totalorder %s1398_s23, %s1570_s0  ;;  %p1087_p13 = scmp.lt.u32.totalorder %s1085_s16, %s1080_s20 }
  0x40   : > { %p1083_p1 = pnand %p1081_p12, %p1359_p4  ;;  %p1089_p5 = scmp.lt.u32.totalorder %s1080_s20, %s1398_s23 }
  0x41   : > { %p1088_p3 = por %p1087_p13, %p1086_p6 }
  0x42   : > { %p1084_p2 = pneg %p1083_p1 }
  0x43   : > { %p1090_p7 = por %p1089_p5, %p1088_p3 }
  0x45   : > { %p1091_p10 = pnand %p1090_p7, %p1084_p2 }
  0x47   : > { %1094 = shalt.err (!%p1091_p10)
}
  0x48   : > { %s1095_s30 = scalar_lea.vmem %s1401_s28, 256  ;;  %s1231_s6 = smov [#allocation6]  }
  0x49   : > { %p1096_p8 = scmp.ne.s32.totalorder %s1401_s28, %s1095_s30  ;;  %s1100_s8 = sshll.u32 %s1231_s6, 4  ;;  %s1101_s8 = int_to_ptr.vmem [resolvable:$false] %s1100_s8 }
  0x4a   : > { %s1102_s26 = scalar_lea.vmem %s1101_s8, 512  ;;  %p1103_p1 = scmp.lt.s32.totalorder %s1401_s28, %s1101_s8 }
  0x4b   : > { %p1098_p9 = pnand %p1096_p8, %p1359_p4  ;;  %p1104_p11 = scmp.lt.s32.totalorder %s1102_s26, %s1095_s30 }
  0x4d   : > { %p1099_p12 = pneg %p1098_p9  ;;  %p1105_p6 = por %p1104_p11, %p1103_p1 }
  0x4f   : > { %p1106_p13 = pnand %p1105_p6, %p1099_p12 }
  0x51   : > { %1109 = shalt.err (!%p1106_p13)
}
  0x52   : > { %s1598_s16 = smov 8   ;;  %s1599_s20 = smov 128  }
  0x53   : > { %968 = dma.hbm_to_vmem [thread:$0]  (!%p1337_p0), %s1398_s23, 256, %s1401_s28, %s1411_s1, %s1599_s20, %s1599_s20, %s1598_s16  }
  0x54   : > { %s238_s10 = scalar_lea.vmem [#allocation11], %s1330_s29  ;;  %s1110_s22 = scalar_lea.hbm %s1407_s19, 256 }
  0x55   : > { %s248_s5 = sshll.u32 %s238_s10, 4  ;;  %p1111_p11 = scmp.ne.s32.totalorder %s1407_s19, %s1110_s22  ;;  %s1439_s5 = int_to_ptr.vmem [resolvable:$true] %s248_s5 }
  0x56   : > { %s1115_s6 = scalar_lea.hbm %s1572_s2, 512  ;;  %p1116_p5 = scmp.lt.u32.totalorder %s1407_s19, %s1572_s2 }
  0x57   : > { %p1113_p2 = pnand %p1111_p11, %p1359_p4  ;;  %p1117_p7 = scmp.lt.u32.totalorder %s1115_s6, %s1110_s22 }
  0x58   : > { %p1119_p8 = scmp.lt.u32.totalorder %s1110_s22, %s1407_s19 }
  0x59   : > { %p1114_p3 = pneg %p1113_p2  ;;  %p1118_p10 = por %p1117_p7, %p1116_p5 }
  0x5b   : > { %p1120_p9 = por %p1119_p8, %p1118_p10 }
  0x5d   : > { %p1121_p12 = pnand %p1120_p9, %p1114_p3 }
  0x5f   : > { %1124 = shalt.err (!%p1121_p12)
}
  0x60   : > { %s1125_s1 = scalar_lea.vmem %s1439_s5, 256  ;;  %s1232_s28 = smov [#allocation11]  }
  0x61   : > { %p1126_p1 = scmp.ne.s32.totalorder %s1439_s5, %s1125_s1  ;;  %s1130_s29 = sshll.u32 %s1232_s28, 4  ;;  %s1131_s29 = int_to_ptr.vmem [resolvable:$false] %s1130_s29 }
  0x62   : > { %s1132_s23 = scalar_lea.vmem %s1131_s29, 512  ;;  %p1133_p11 = scmp.lt.s32.totalorder %s1439_s5, %s1131_s29 }
  0x63   : > { %p1128_p6 = pnand %p1126_p1, %p1359_p4  ;;  %p1134_p2 = scmp.lt.s32.totalorder %s1132_s23, %s1125_s1 }
  0x65   : > { %p1129_p13 = pneg %p1128_p6  ;;  %p1135_p5 = por %p1134_p2, %p1133_p11 }
  0x67   : > { %p1136_p7 = pnand %p1135_p5, %p1129_p13 }
  0x69   : > { %1139 = shalt.err (!%p1136_p7)
}
  0x6a   : > { %974 = dma.hbm_to_vmem [thread:$0]  (!%p1337_p0), %s1407_s19, 256, %s1439_s5, %s1353_s11, %s1599_s20, %s1599_s20, %s1598_s16  }
  0x6b   : > { %p1600_p4 = scmp.ne.s32.totalorder %s1596_s9, 0 }
  0x6c   : > { %s1469_s21 = sand.u32 (!%p1600_p4), 1, %s1210_s13   ;;  %p1601_p3 = scmp.ne.s32.totalorder (!%p1600_p4), %s1587_s24, 0 }
  0x6d   : > { %260 = sbr.rel (%p1600_p4) target bundleno = 1055 (0x41f), region = 32  ;;  %s1472_s10 = sshll.u32 (!%p1600_p4), %s1469_s21, 4 }
  0x6e   : > { %s263_s4 = scalar_lea.sflag (!%p1600_p4), [#allocation7], %s1469_s21  ;;  %s266_s22 = scalar_lea.vmem (!%p1600_p4), [#allocation6], %s1472_s10 }
  0x74   : > { %1193 = dma.done.wait (%p1601_p3), %s263_s4, 256  }
  0x75   : > { %1195 = vsyncadd (%p1601_p3), %s263_s4, 4294967040  ;;  %s271_s11 = sand.u32 1, %s1290_s18   ;;  %s275_s9 = scalar_lea.vmem [#allocation9], %s1472_s10 }
  0x76   : > { %s272_s19 = scalar_lea.sflag [#allocation10], %s271_s11 }
  0x77   : > { %1197 = dma.done.wait (%p1601_p3), %s272_s19, 512  }
  0x78   : > { %1199 = vsyncadd (%p1601_p3), %s272_s19, 4294966784  ;;  %vm328_vm0 = vcmask 130048   ;;  %v1233_v0 = vmov 0.0   ;;  %vm1234_vm1 = vmmov 0   ;;  %v339_v1 = vld [vmem:[%s275_s9 + $0x8] sm:$0xff]  ;;  %v338_v3 = vld [vmem:[%s275_s9] sm:$0xff] }
  0x79   : > { %942 = vmatprep.subr.mxu1 %v1233_v0  ;;  %336 = vst.msk [vmem:[#allocation5] sm:$0xff] %vm328_vm0, %v1233_v0  ;;  %337 = vst.msk [vmem:[#allocation5 + $0x8] sm:$0xff] %vm328_vm0, %v1233_v0  ;;  %944 = vmatprep.mubr.msk.f32.mxu1 %vm1234_vm1, %v1233_v0  ;;  %v325_v2 = vld [vmem:[%s266_s22 + $0x8] sm:$0xff]  ;;  %v324_v5 = vld [vmem:[%s266_s22] sm:$0xff]  ;;  %vm331_vm2 = vcmask 7168   ;;  %v1235_v9 = vmov -inf  }
  0x7a   : > { %937 = vmatprep.subr.mxu0 %v1233_v0  ;;  %939 = vmatprep.mubr.msk.f32.mxu0 %vm1234_vm1, %v1233_v0  ;;  %v327_v4 = vmul.f32 0.25, %v325_v2  ;;  %v326_v6 = vmul.f32 0.25, %v324_v5  ;;  %333 = vst.msk [vmem:[#allocation3 + $0x8] sm:$0xff] %vm331_vm2, %v1235_v9  ;;  %332 = vst.msk [vmem:[#allocation3] sm:$0xff] %vm331_vm2, %v1235_v9  ;;  %vm499_vm3 = vcmask 64512   ;;  %v1236_v16 = vmov 0  }
  0x7b   : > { %943 = vmatpush3.xpose.msk.msra.mxu1 %vm328_vm0, %v339_v1  ;;  %938 = vmatpush3.xpose.msk.msra.mxu0 %vm328_vm0, %v338_v3  ;;  %334 = vst.msk [vmem:[#allocation4] sm:$0xff] %vm331_vm2, %v1233_v0  ;;  %335 = vst.msk [vmem:[#allocation4 + $0x8] sm:$0xff] %vm331_vm2, %v1233_v0  ;;  %s284_s18 = scalar_lea.vmem [#allocation11], %s1472_s10  ;;  %s915_s24 = sshll.u32 %s1469_s21, 3  ;;  %vm739_vm4 = vcmask 261248  }
  0x7c   : > { %952 = vmatprep.subr.mxu1 %v1233_v0  ;;  %947 = vmatprep.subr.mxu0 %v1233_v0  ;;  %330 = vst.msk [vmem:[#allocation2 + $0x8] sm:$0xff] %vm328_vm0, %v327_v4  ;;  %329 = vst.msk [vmem:[#allocation2] sm:$0xff] %vm328_vm0, %v326_v6  ;;  %v341_v25 = vld [vmem:[%s284_s18 + $0x8] sm:$0xff]  ;;  %v340_v26 = vld [vmem:[%s284_s18] sm:$0xff]  ;;  %s1237_s16 = smov 16   ;;  %s316_s20 = scalar_lea.vmem [#allocation12], %s915_s24 }
  0x7d   : > { %1036 = vset.pattern.permute.xlu1 %v1236_v16  ;;  %1037 = vset.pattern.permute.xlu0 %v1236_v16  ;;  %s923_s5 = sshll.u32 %s1218_s15, 7  ;;  %s757_s7 = sshll.u32 %s316_s20, 4  ;;  %s1523_s7 = int_to_ptr.vmem [resolvable:$true] %s757_s7 }
  0x7e   : > { %s1521_s8 = scalar_lea.hbm %s1573_s3, %s923_s5  ;;  %s742_s26 = scalar_lea.sflag [#allocation8], %s1469_s21 }
  0x7f   : > { %s1140_s1 = scalar_lea.vmem %s1523_s7, 128  ;;  %p1602_p10 = scmp.ne.s32.totalorder %s1588_s25, 0 }
  0x80   : > { %v546_v52 = vld [vmem:[#allocation5 + $0x8] sm:$0xff]  ;;  %v545_v54 = vld [vmem:[#allocation5] sm:$0xff]  ;;  %p1141_p0 = scmp.ne.s32.totalorder %s1523_s7, %s1140_s1  ;;  %s1238_s15 = smov [#allocation12]  }
  0x81   : > { %v498_v17 = vld [vmem:[#allocation3 + $0x8] sm:$0xff]  ;;  %v497_v20 = vld [vmem:[#allocation3] sm:$0xff]  ;;  %s1144_s28 = sshll.u32 %s1238_s15, 4  ;;  %s1145_s28 = int_to_ptr.vmem [resolvable:$false] %s1144_s28 }
  0x82   : > { %v531_v41 = vld [vmem:[#allocation4 + $0x8] sm:$0xff]  ;;  %v530_v44 = vld [vmem:[#allocation4] sm:$0xff]  ;;  %p1142_p8 = pnand %p1141_p0, %p1602_p10  ;;  %s1146_s29 = scalar_lea.vmem %s1145_s28, 256 }
  0x83   : > { %v343_v7 = vld [vmem:[#allocation2 + $0x8] sm:$0xff]  ;;  %v342_v8 = vld [vmem:[#allocation2] sm:$0xff]  ;;  %p1147_p12 = scmp.lt.s32.totalorder %s1523_s7, %s1145_s28  ;;  %p1148_p1 = scmp.lt.s32.totalorder %s1146_s29, %s1140_s1 }
  0x84   : > { %945 = vmatmul.mubr.msk.f32.vlgmr.msra.gmra.mrb[0].mxu1 %vm328_vm0, %v343_v7  ;;  %940 = vmatmul.mubr.msk.f32.vlgmr.msra.gmra.mrb[0].mxu0 %vm328_vm0, %v342_v8  ;;  %p1143_p9 = pneg %p1142_p8 }
  0x85   : > { %954 = vmatprep.mubr.msk.f32.mxu1 %vm1234_vm1, %v1233_v0  ;;  %949 = vmatprep.mubr.msk.f32.mxu0 %vm1234_vm1, %v1233_v0  ;;  %p1149_p6 = por %p1148_p1, %p1147_p12 }
  0x86   : > { %953 = vmatpush3.msra.mxu1 %v341_v25  ;;  %948 = vmatpush3.msra.mxu0 %v340_v26 }
  0x87   : > { %p1150_p13 = pnand %p1149_p6, %p1143_p9 }
 0x157   : > { %v493_v10 = vpop.f32.mrb[0].mxu1  ;;  %v417_v13 = vpop.f32.mrb[0].mxu0 }
 0x158   : > { %v946_v11 = vpop.f32.mrb[1].mxu1  ;;  %v503_v12 = vsel %vm499_vm3, %v493_v10, -inf  ;;  %v941_v14 = vpop.f32.mrb[1].mxu0  ;;  %v500_v15 = vsel %vm499_vm3, %v417_v13, -inf }
 0x159   : > { %504 = vmax.xlane.f32.xlu0 %v503_v12 }
 0x15d   : > { %501 = vmax.xlane.f32.xlu0 %v500_v15 }
 0x1e6   : > { %v505_v18 = vpop.xlane.xlu0 %504 }
 0x1e7   : > { %v507_v19 = vmax.f32 %v498_v17, %v505_v18 }
 0x1e9   : > { %v509_v21 = vsub.f32 %v498_v17, %v507_v19  ;;  %710 = vst.msk [vmem:[#allocation3 + $0x8] sm:$0xff] %vm331_vm2, %v507_v19  ;;  %521 = vperm.xlu1 %1036, %v507_v19  }
 0x1ea   : > { %v502_v22 = vpop.xlane.xlu0 %501 }
 0x1eb   : > { %v506_v23 = vmax.f32 %v497_v20, %v502_v22  ;;  %v512_v37 = vmul.f32 1.442695, %v509_v21 }
 0x1ed   : > { %v508_v24 = vsub.f32 %v497_v20, %v506_v23  ;;  %709 = vst.msk [vmem:[#allocation3] sm:$0xff] %vm331_vm2, %v506_v23  ;;  %516 = vperm.xlu1 %1036, %v506_v23  }
 0x1ef   : > { %v510_v38 = vmul.f32 1.442695, %v508_v24 }
 0x268   : > { %v522_v27 = vpop.permute.xlu1 %521 }
 0x269   : > { %v525_v28 = vsub.f32 %v493_v10, %v522_v27 }
 0x26b   : > { %v528_v29 = vmul.f32 1.442695, %v525_v28 }
 0x26c   : > { %v517_v30 = vpop.permute.xlu1 %516 }
 0x26d   : > { %1038 = vpow2.f32 %v528_v29  ;;  %v524_v31 = vsub.f32 %v417_v13, %v517_v30 }
 0x26f   : > { %v526_v32 = vmul.f32 1.442695, %v524_v31 }
 0x271   : > { %1040 = vpow2.f32 %v526_v32 }
 0x272   : > { %1042 = vpow2.f32 %v512_v37 }
 0x273   : > { %1044 = vpow2.f32 %v510_v38 }
 0x277   : > { %v1039_v33 = vpop.eup %1038 }
 0x278   : > { %955 = vmatmul.mubr.msk.f32.vlgmr.msra.gmra.mrb[2].mxu1 %vm499_vm3, %v1039_v33  ;;  %v537_v34 = vsel %vm499_vm3, %v1039_v33, 0.0 }
 0x279   : > { %538 = vadd.xlane.f32.xlu0 %v537_v34 }
 0x27b   : > { %v1041_v35 = vpop.eup %1040 }
 0x27c   : > { %950 = vmatmul.mubr.msk.f32.vlgmr.msra.gmra.mrb[2].mxu0 %vm499_vm3, %v1041_v35  ;;  %v534_v36 = vsel %vm499_vm3, %v1041_v35, 0.0  ;;  %v1043_v39 = vpop.eup %1042 }
 0x27d   : > { %535 = vadd.xlane.f32.xlu1 %v534_v36  ;;  %v1045_v40 = vpop.eup %1044  ;;  %v533_v42 = vmul.f32 %v1043_v39, %v531_v41 }
 0x27e   : > { %v532_v46 = vmul.f32 %v1045_v40, %v530_v44 }
 0x28f   : > { %554 = vperm.xlu0 %1037, %v1043_v39  }
 0x293   : > { %549 = vperm.xlu0 %1037, %v1045_v40  }
 0x306   : > { %v539_v43 = vpop.xlane.xlu0 %538 }
 0x307   : > { %v541_v45 = vadd.f32 %v539_v43, %v533_v42 }
 0x309   : > { %544 = vst.msk [vmem:[#allocation4 + $0x8] sm:$0xff] %vm331_vm2, %v541_v45 }
 0x30a   : > { %v536_v47 = vpop.xlane.xlu1 %535 }
 0x30b   : > { %v540_v48 = vadd.f32 %v536_v47, %v532_v46 }
 0x30d   : > { %543 = vst.msk [vmem:[#allocation4] sm:$0xff] %vm331_vm2, %v540_v48 }
 0x30e   : > { %v555_v51 = vpop.permute.xlu0 %554 }
 0x30f   : > { %v558_v53 = vmul.f32 %v555_v51, %v546_v52 }
 0x310   : > { %v727_v49 = vld [vmem:[#allocation4 + $0x8] sm:$0xff] }
 0x311   : > { %730 = vperm.xlu1 %1036, %v727_v49  }
 0x312   : > { %v550_v55 = vpop.permute.xlu0 %549 }
 0x313   : > { %v557_v59 = vmul.f32 %v550_v55, %v545_v54 }
 0x314   : > { %v715_v50 = vld [vmem:[#allocation4] sm:$0xff] }
 0x315   : > { %718 = vperm.xlu0 %1037, %v715_v50  }
 0x34b   : > { %v701_v56 = vpop.f32.mrb[2].mxu1 }
 0x34c   : > { %v706_v57 = vadd.f32 %v701_v56, %v558_v53  ;;  %v956_v58 = vpop.f32.mrb[3].mxu1 }
 0x34e   : > { %708 = vst.msk [vmem:[#allocation5 + $0x8] sm:$0xff] %vm328_vm0, %v706_v57 }
 0x34f   : > { %v628_v60 = vpop.f32.mrb[2].mxu0 }
 0x350   : > { %v705_v61 = vadd.f32 %v628_v60, %v557_v59  ;;  %v951_v62 = vpop.f32.mrb[3].mxu0 }
 0x352   : > { %707 = vst.msk [vmem:[#allocation5] sm:$0xff] %vm328_vm0, %v705_v61 }
 0x355   : > { %v725_v2 = vld [vmem:[#allocation5 + $0x8] sm:$0xff] }
 0x359   : > { %v714_v5 = vld [vmem:[#allocation5] sm:$0xff] }
 0x390   : > { %v731_v63 = vpop.permute.xlu1 %730 }
 0x391   : > { %1046 = vrcp.f32 %v731_v63 }
 0x394   : > { %v719_v0 = vpop.permute.xlu0 %718 }
 0x395   : > { %1048 = vrcp.f32 %v719_v0 }
 0x39b   : > { %v1047_v1 = vpop.eup %1046 }
 0x39c   : > { %v734_v3 = vmul.f32 %v1047_v1, %v725_v2 }
 0x39e   : > { %736 = vrot.lane.b32.xlu1 %v734_v3, %s1237_s16 }
 0x39f   : > { %v1049_v4 = vpop.eup %1048 }
 0x3a0   : > { %v722_v6 = vmul.f32 %v1049_v4, %v714_v5 }
 0x3a2   : > { %723 = vst.msk [vmem:[%s316_s20] sm:$0xff] %vm328_vm0, %v722_v6 }
 0x410   : > { %v737_v7 = vpop.permute.xlu1 %736 }
 0x411   : > { %740 = vst.msk [vmem:[%s316_s20] sm:$0xff] %vm739_vm4, %v737_v7 }
 0x412   : > { %1153 = shalt.err (!%p1150_p13)
}
 0x413   : > { %s1154_s23 = scalar_lea.hbm %s1521_s8, 128  ;;  %s1158_s4 = scalar_lea.hbm %s1573_s3, 256 }
 0x414   : > { %p1155_p11 = scmp.ne.s32.totalorder %s1521_s8, %s1154_s23  ;;  %p1159_p7 = scmp.lt.u32.totalorder %s1521_s8, %s1573_s3 }
 0x415   : > { %p1160_p4 = scmp.lt.u32.totalorder %s1158_s4, %s1154_s23  ;;  %p1162_p0 = scmp.lt.u32.totalorder %s1154_s23, %s1521_s8 }
 0x416   : > { %p1156_p2 = pnand %p1155_p11, %p1602_p10 }
 0x417   : > { %p1161_p3 = por %p1160_p4, %p1159_p7 }
 0x418   : > { %p1157_p5 = pneg %p1156_p2 }
 0x419   : > { %p1163_p8 = por %p1162_p0, %p1161_p3 }
 0x41b   : > { %p1164_p9 = pnand %p1163_p8, %p1157_p5 }
 0x41d   : > { %1167 = shalt.err (!%p1164_p9)
}
 0x41e   : > { %963 = dma.vmem_to_hbm [thread:$0]  (%p1602_p10), %s1523_s7, 128, %s1521_s8, %s742_s26  }
 0x41f PF: > { %s769_s19 = sand.u32 1, %s1206_s12   ;;  %p1603_p12 = scmp.ne.s32.totalorder %s1590_s27, 0 }
 0x420   : > { %p1604_p1 = scmp.ge.s32.totalorder %s1226_s17, 2  ;;  %s770_s9 = scalar_lea.sflag [#allocation8], %s769_s19 }
 0x422   : > { %p976_p6 = pnand %p1604_p1, %p1603_p12 }
 0x424   : > { %1201 = dma.done.wait (!%p976_p6), %s770_s9, 128  }
 0x425   : > { %1203 = vsyncadd (!%p976_p6), %s770_s9, 4294967168  ;;  %s22_s17 = sadd.s32 1, %s1226_s17   ;;  %s1605_s25 = sld [smem:[#allocation18_spill]] }
 0x426   : > { %p19_p13 = scmp.ge.s32.totalorder %s22_s17, 4   ;;  %s1606_s15 = sld [smem:[#allocation16_spill]] }
 0x427   : > { %s1607_s16 = sld [smem:[#allocation17_spill]]  ;;  %s1608_s12 = smov %s1210_s13 }
 0x428   : > { %s1609_s13 = smov %s1214_s14  ;;  %21 = sbr.rel (!%p19_p13) target bundleno = 10 (0xa), region = 111 }
 0x42b   : > { %s1610_s14 = smov %s1605_s25 }
 0x42f   :  { %775 = vsyncpa [#allocation7], 1 }
 0x430   :  { %777 = vsyncpa [#allocation7 + $0x1], 1 }
 0x431   :  { %778 = vsyncpa [#allocation10], 1 }
 0x432   :  { %780 = vsyncpa [#allocation10 + $0x1], 1 }
 0x433   :  { %781 = vsyncpa [#allocation8], 1 }
 0x434   :  { %783 = vsyncpa [#allocation8 + $0x1], 1 }

</bundles_post_ra>
